<compile_context>
chip_gen: v5e
topology: v5e:2x2
jax: 0.10.0
libtpu: 0.0.40
codegen_flags: <defaults>
</compile_context>

<pallas_src>
import functools

import jax
import jax.numpy as jnp
from jax.experimental import pallas as pl
from jax.experimental.pallas import tpu as pltpu


def _round_up(x, m):
    return ((x + m - 1) // m) * m


# ----------------------------- kernel -------------------------------------- #

def _actor_kernel(x_ref, p_ref, o_ref, *, in_p, h_p, out_p, offs):
    """One batch tile of the fused 3-layer MLP.

    x_ref: (TB, in_p) f32       padded states (lane-dense)
    p_ref: (R, LANE)  f32       packed [w1|b1|w2|b2|w3|b3], row sections 8-aligned
    o_ref: (TB, out_p) f32      padded outputs (lane-dense)
    """
    x = x_ref[...]

    w1 = p_ref[offs["w1"]:offs["w1"] + in_p, 0:h_p]
    b1 = p_ref[offs["b1"]:offs["b1"] + 1,    0:h_p]
    w2 = p_ref[offs["w2"]:offs["w2"] + h_p,  0:h_p]
    b2 = p_ref[offs["b2"]:offs["b2"] + 1,    0:h_p]
    w3 = p_ref[offs["w3"]:offs["w3"] + h_p,  0:out_p]
    b3 = p_ref[offs["b3"]:offs["b3"] + 1,    0:out_p]

    # Layer 1: Linear + ReLU (MXU matmul, f32 accumulate)
    h1 = jnp.maximum(jnp.dot(x, w1, preferred_element_type=jnp.float32) + b1, 0.0)
    # Layer 2: Linear + ReLU
    h2 = jnp.maximum(jnp.dot(h1, w2, preferred_element_type=jnp.float32) + b2, 0.0)
    # Layer 3: Linear + tanh
    h3 = jnp.dot(h2, w3, preferred_element_type=jnp.float32) + b3
    o_ref[...] = jnp.tanh(h3).astype(o_ref.dtype)


# --------------------------- host-side API ---------------------------------- #

def pack_actor_params(params, input_size, hidden_size, output_size):
    """Zero-pad every tensor to lane-dense (multiple-of-128) shapes and pack all
    six tensors into one contiguous f32 buffer (single HBM->VMEM DMA)."""
    IN_P = _round_up(input_size, 128)
    H_P = _round_up(hidden_size, 128)
    OUT_P = _round_up(output_size, 128)
    LANE = max(H_P, OUT_P)

    def pad2(a, rows, cols):
        a = a.astype(jnp.float32)
        return jnp.pad(a, ((0, rows - a.shape[0]), (0, cols - a.shape[1])))

    sections = [
        ("w1", pad2(params["w1"], IN_P, LANE)),
        ("b1", pad2(params["b1"], 8, LANE)),      # bias lives in row 0 of its block
        ("w2", pad2(params["w2"], H_P, LANE)),
        ("b2", pad2(params["b2"], 8, LANE)),
        ("w3", pad2(params["w3"], H_P, LANE)),
        ("b3", pad2(params["b3"], 8, LANE)),
    ]

    offsets, r = {}, 0
    for name, arr in sections:
        offsets[name] = r
        r += arr.shape[0]
    packed = jnp.concatenate([arr for _, arr in sections], axis=0)

    meta = dict(IN_P=IN_P, H_P=H_P, OUT_P=OUT_P, LANE=LANE, R=r,
                input_size=input_size, hidden_size=hidden_size,
                output_size=output_size, offsets=offsets)
    return packed, meta


def actor_net_forward(state, packed_params, meta):
    """state: (B, input_size) f32; packed_params/meta from pack_actor_params."""
    B = state.shape[0]
    IN_P, H_P, OUT_P, LANE = meta["IN_P"], meta["H_P"], meta["OUT_P"], meta["LANE"]
    in_size, out_size = meta["input_size"], meta["output_size"]

    # Batch tiling: small batches -> one 8-aligned tile; large batches -> 128-row
    # tiles sharded across TensorCores via the "parallel" grid axis.
    if B <= 128:
        TB = _round_up(max(B, 8), 8)
        B_pad = TB
    else:
        TB = 128
        B_pad = _round_up(B, TB)

    # Lane-dense, zero-padded input slab (zeros in padded rows/cols are harmless:
    # padded weight rows/cols are zero and padded biases are zero).
    x = jnp.zeros((B_pad, IN_P), jnp.float32)
    x = x.at[:B, :in_size].set(state.astype(jnp.float32))

    kernel = functools.partial(_actor_kernel, in_p=IN_P, h_p=H_P, out_p=OUT_P,
                               offs=meta["offsets"])

    out_padded = pl.pallas_call(
        kernel,
        out_shape=jax.ShapeDtypeStruct((B_pad, OUT_P), jnp.float32),
        grid=(B_pad // TB,),
        in_specs=[
            pl.BlockSpec((TB, IN_P), lambda i: (i, 0)),        # per-tile states
            pl.BlockSpec((meta["R"], LANE), lambda i: (0, 0)),  # packed params,
            # constant block index -> stays VMEM-resident across grid steps
        ],
        out_specs=pl.BlockSpec((TB, OUT_P), lambda i: (i, 0)),
        compiler_params=pltpu.CompilerParams(
            dimension_semantics=("parallel",)),
    )(x, packed_params)

    return out_padded[:B, :out_size]


# ------------------------ init + pure-JAX reference ------------------------- #

def init_actor_params(key, input_size, hidden_size, output_size):
    """PyTorch nn.Linear default init: U(-1/sqrt(fan_in), 1/sqrt(fan_in)).
    Weights stored (in, out) = transpose of PyTorch's (out, in)."""
    keys = jax.random.split(key, 6)

    def linear(kw, kb, fan_in, fan_out):
        bound = 1.0 / jnp.sqrt(jnp.float32(fan_in))
        w = jax.random.uniform(kw, (fan_in, fan_out), jnp.float32, -bound, bound)
        b = jax.random.uniform(kb, (1, fan_out), jnp.float32, -bound, bound)
        return w, b

    w1, b1 = linear(keys[0], keys[1], input_size, hidden_size)
    w2, b2 = linear(keys[2], keys[3], hidden_size, hidden_size)
    w3, b3 = linear(keys[4], keys[5], hidden_size, output_size)
    return {"w1": w1, "b1": b1, "w2": w2, "b2": b2, "w3": w3, "b3": b3}


def actor_net_ref(state, p):
    h = jnp.maximum(state @ p["w1"] + p["b1"], 0.0)
    h = jnp.maximum(h @ p["w2"] + p["b2"], 0.0)
    return jnp.tanh(h @ p["w3"] + p["b3"])


# --------------------------------- demo ------------------------------------- #

if __name__ == "__main__":
    key = jax.random.PRNGKey(0)
    k_param, k_state = jax.random.split(key)

    batch, input_size, hidden_size, output_size = 8, 16, 32, 4

    params = init_actor_params(k_param, input_size, hidden_size, output_size)
    packed, meta = pack_actor_params(params, input_size, hidden_size, output_size)

    # Small batch (single grid step).
    state = jax.random.normal(k_state, (batch, input_size), jnp.float32)
    out = jax.block_until_ready(actor_net_forward(state, packed, meta))
    ref = actor_net_ref(state, params)
    assert out.shape == (batch, output_size), out.shape
    assert jnp.allclose(out, ref, atol=1e-5, rtol=1e-5), "mismatch vs reference (B=8)"

    # Larger batch exercising the parallel batch grid + padding path.
    big = 200
    state2 = jax.random.normal(jax.random.PRNGKey(1), (big, input_size), jnp.float32)
    out2 = jax.block_until_ready(actor_net_forward(state2, packed, meta))
    ref2 = actor_net_ref(state2, params)
    assert out2.shape == (big, output_size), out2.shape
    assert jnp.allclose(out2, ref2, atol=1e-5, rtol=1e-5), "mismatch vs reference (B=200)"

    print("KERNEL_OK")
</pallas_src>

<mosaic_0001>
module attributes {stable_mosaic.version = 11 : i64} {
  func.func @_actor_kernel(%arg0: i32, %arg1: memref<8x128xf32, #tpu.memory_space<vmem>>, %arg2: memref<408x128xf32, #tpu.memory_space<vmem>>, %arg3: memref<8x128xf32, #tpu.memory_space<vmem>>) attributes {dimension_semantics = [#tpu.dimension_semantics<parallel>], iteration_bounds = array<i64: 1>, scalar_prefetch = 0 : i64, scratch_operands = 0 : i64, tpu.core_type = #tpu.core_type<tc>, window_params = [{transform_indices = @transform_0, window_bounds = array<i64: 8, 128>}, {pipeline_mode = #tpu.pipeline_mode<synchronous>, transform_indices = @transform_1, window_bounds = array<i64: 408, 128>}, {transform_indices = @transform_2, window_bounds = array<i64: 8, 128>}]} {
    %c0 = arith.constant 0 : index
    %c0_0 = arith.constant 0 : index
    %0 = vector.load %arg1[%c0, %c0_0] : memref<8x128xf32, #tpu.memory_space<vmem>>, vector<8x128xf32>
    %c0_1 = arith.constant 0 : index
    %c0_2 = arith.constant 0 : index
    %1 = vector.load %arg2[%c0_1, %c0_2] : memref<408x128xf32, #tpu.memory_space<vmem>>, vector<128x128xf32>
    %c128 = arith.constant 128 : index
    %c0_3 = arith.constant 0 : index
    %2 = vector.load %arg2[%c128, %c0_3] : memref<408x128xf32, #tpu.memory_space<vmem>>, vector<1x128xf32>
    %c136 = arith.constant 136 : index
    %c0_4 = arith.constant 0 : index
    %3 = vector.load %arg2[%c136, %c0_4] : memref<408x128xf32, #tpu.memory_space<vmem>>, vector<128x128xf32>
    %c264 = arith.constant 264 : index
    %c0_5 = arith.constant 0 : index
    %4 = vector.load %arg2[%c264, %c0_5] : memref<408x128xf32, #tpu.memory_space<vmem>>, vector<1x128xf32>
    %c272 = arith.constant 272 : index
    %c0_6 = arith.constant 0 : index
    %5 = vector.load %arg2[%c272, %c0_6] : memref<408x128xf32, #tpu.memory_space<vmem>>, vector<128x128xf32>
    %c400 = arith.constant 400 : index
    %c0_7 = arith.constant 0 : index
    %6 = vector.load %arg2[%c400, %c0_7] : memref<408x128xf32, #tpu.memory_space<vmem>>, vector<1x128xf32>
    %cst = arith.constant dense<0.000000e+00> : vector<8x128xf32>
    %7 = tpu.matmul %0, %1, %cst {dimension_numbers = #tpu.dot_dimension_numbers<[1], [0], [0], [1], [0, 0, 1, 1], [], []>} : vector<8x128xf32>, vector<128x128xf32>, vector<8x128xf32> -> vector<8x128xf32>
    %8 = vector.broadcast %2 : vector<1x128xf32> to vector<8x128xf32>
    %9 = arith.addf %7, %8 : vector<8x128xf32>
    %cst_8 = arith.constant 0.000000e+00 : f32
    %10 = vector.broadcast %cst_8 : f32 to vector<8x128xf32>
    %11 = arith.maximumf %9, %10 : vector<8x128xf32>
    %cst_9 = arith.constant dense<0.000000e+00> : vector<8x128xf32>
    %12 = tpu.matmul %11, %3, %cst_9 {dimension_numbers = #tpu.dot_dimension_numbers<[1], [0], [0], [1], [0, 0, 1, 1], [], []>} : vector<8x128xf32>, vector<128x128xf32>, vector<8x128xf32> -> vector<8x128xf32>
    %13 = vector.broadcast %4 : vector<1x128xf32> to vector<8x128xf32>
    %14 = arith.addf %12, %13 : vector<8x128xf32>
    %cst_10 = arith.constant 0.000000e+00 : f32
    %15 = vector.broadcast %cst_10 : f32 to vector<8x128xf32>
    %16 = arith.maximumf %14, %15 : vector<8x128xf32>
    %cst_11 = arith.constant dense<0.000000e+00> : vector<8x128xf32>
    %17 = tpu.matmul %16, %5, %cst_11 {dimension_numbers = #tpu.dot_dimension_numbers<[1], [0], [0], [1], [0, 0, 1, 1], [], []>} : vector<8x128xf32>, vector<128x128xf32>, vector<8x128xf32> -> vector<8x128xf32>
    %18 = vector.broadcast %6 : vector<1x128xf32> to vector<8x128xf32>
    %19 = arith.addf %17, %18 : vector<8x128xf32>
    %20 = math.tanh %19 : vector<8x128xf32>
    %c0_12 = arith.constant 0 : index
    %c0_13 = arith.constant 0 : index
    %21 = vector.load %arg3[%c0_12, %c0_13] : memref<8x128xf32, #tpu.memory_space<vmem>>, vector<8x128xf32>
    tpu.vector_store %arg3[%c0_12, %c0_13], %20 {strides = array<i32>} : memref<8x128xf32, #tpu.memory_space<vmem>>, vector<8x128xf32>,
    return
  }
  func.func @transform_0(%arg0: i32) -> (i32, i32) {
    %c0_i32 = arith.constant 0 : i32
    %c0_i32_0 = arith.constant 0 : i32
    return %arg0, %c0_i32 : i32, i32
  }
  func.func @transform_1(%arg0: i32) -> (i32, i32) {
    %c0_i32 = arith.constant 0 : i32
    %c0_i32_0 = arith.constant 0 : i32
    %c0_i32_1 = arith.constant 0 : i32
    return %c0_i32, %c0_i32_0 : i32, i32
  }
  func.func @transform_2(%arg0: i32) -> (i32, i32) {
    %c0_i32 = arith.constant 0 : i32
    %c0_i32_0 = arith.constant 0 : i32
    return %arg0, %c0_i32 : i32, i32
  }
}

</mosaic_0001>

<bundles_post_ra>
// kernel: tpu_custom_call.1
= control target key start
LH: loop header
LB: loop body
LE: loop exit
PB: predicated region body
PF: predicated region fallthrough
CT: control target
= control target key end

     0   :  { %7 = vsyncpa [#allocation3], 0  ;;  %s296_s0 = inlined_call_operand.hbm [shape: f32[8,128], index: 0, kind: input, shape index: {}]   ;;  %s297_s1 = inlined_call_operand.hbm [shape: f32[408,128], index: 1, kind: input, shape index: {}]   ;;  %s298_s2 = inlined_call_operand.hbm [shape: f32[8,128], index: 2, kind: output, shape index: {}]  }
   0x1   :  { %8 = vsyncpa [#allocation6], 0 }
   0x2   :  { %9 = vsyncpa [#allocation4], 0  ;;  %s15_s11 = sshll.u32 %s296_s0, 4  ;;  %s267_s12 = smov [#allocation2]   ;;  %s16_s11 = int_to_ptr.hbm [resolvable:$true] %s15_s11 }
   0x3   :  { %s17_s13 = sshll.u32 %s267_s12, 4  ;;  %s25_s16 = sshll.u32 %s297_s1, 4  ;;  %s18_s13 = int_to_ptr.vmem [resolvable:$true] %s17_s13  ;;  %s26_s16 = int_to_ptr.hbm [resolvable:$true] %s25_s16 }
   0x4   :  { %20 = dma.hbm_to_vmem [thread:$0]  %s16_s11, 128, %s18_s13, [#allocation3]  }
   0x5   :  { %s268_s17 = smov [#allocation5]   ;;  %s269_s19 = smov 128  }
   0x6   :  { %s27_s18 = sshll.u32 %s268_s17, 4  ;;  %s270_s20 = smov 8   ;;  %s28_s18 = int_to_ptr.vmem [resolvable:$true] %s27_s18 }
   0x7   :  { %33 = dma.hbm_to_vmem [thread:$0]  %s26_s16, 6528, %s28_s18, [#allocation6], %s269_s19, %s269_s19, %s270_s20  }
   0x8   :  { %261 = dma.done.wait [#allocation3], 128  }
   0x9   :  { %262 = vsyncadd [#allocation3], 4294967168 }
   0xa   :  { %263 = dma.done.wait [#allocation6], 6528  }
   0xb   :  { %264 = vsyncadd [#allocation6], 4294960768  ;;  %v58_v0 = vld [vmem:[#allocation5 + $0x78] sm:$0xff]  ;;  %v57_v1 = vld [vmem:[#allocation5 + $0x70] sm:$0xff]  ;;  %s271_s0 = smov [#allocation7]   ;;  %s168_s23 = sshll.u32 %s298_s2, 4  ;;  %s169_s23 = int_to_ptr.hbm [resolvable:$true] %s168_s23 }
   0xc   :  { %95 = vmatpush.msra.mxu0 %v58_v0  ;;  %v56_v2 = vld [vmem:[#allocation5 + $0x68] sm:$0xff]  ;;  %v55_v3 = vld [vmem:[#allocation5 + $0x60] sm:$0xff]  ;;  %v54_v5 = vld [vmem:[#allocation5 + $0x58] sm:$0xff]  ;;  %s166_s1 = sshll.u32 %s271_s0, 4  ;;  %s167_s1 = int_to_ptr.vmem [resolvable:$true] %s166_s1 }
   0xd   :  { %v75_v4 = vld [vmem:[#allocation5 + $0x100] sm:$0xff]  ;;  %v74_v6 = vld [vmem:[#allocation5 + $0xf8] sm:$0xff]  ;;  %v73_v7 = vld [vmem:[#allocation5 + $0xf0] sm:$0xff] }
   0xe   :  { %96 = vmatpush.msra.mxu0 %v57_v1  ;;  %117 = vmatpush.msra.mxu1 %v75_v4  ;;  %v53_v8 = vld [vmem:[#allocation5 + $0x50] sm:$0xff]  ;;  %v72_v9 = vld [vmem:[#allocation5 + $0xe8] sm:$0xff]  ;;  %v71_v11 = vld [vmem:[#allocation5 + $0xe0] sm:$0xff] }
   0xf   :  { %v52_v10 = vld [vmem:[#allocation5 + $0x48] sm:$0xff]  ;;  %v51_v12 = vld [vmem:[#allocation5 + $0x40] sm:$0xff]  ;;  %v70_v13 = vld [vmem:[#allocation5 + $0xd8] sm:$0xff] }
  0x10   :  { %97 = vmatpush.msra.mxu0 %v56_v2  ;;  %118 = vmatpush.msra.mxu1 %v74_v6  ;;  %v50_v14 = vld [vmem:[#allocation5 + $0x38] sm:$0xff]  ;;  %v69_v15 = vld [vmem:[#allocation5 + $0xd0] sm:$0xff]  ;;  %v68_v17 = vld [vmem:[#allocation5 + $0xc8] sm:$0xff] }
  0x11   :  { %v49_v16 = vld [vmem:[#allocation5 + $0x30] sm:$0xff]  ;;  %v48_v18 = vld [vmem:[#allocation5 + $0x28] sm:$0xff]  ;;  %v67_v19 = vld [vmem:[#allocation5 + $0xc0] sm:$0xff] }
  0x12   :  { %98 = vmatpush.msra.mxu0 %v55_v3  ;;  %119 = vmatpush.msra.mxu1 %v73_v7  ;;  %v47_v20 = vld [vmem:[#allocation5 + $0x20] sm:$0xff]  ;;  %v66_v21 = vld [vmem:[#allocation5 + $0xb8] sm:$0xff]  ;;  %v65_v23 = vld [vmem:[#allocation5 + $0xb0] sm:$0xff] }
  0x13   :  { %v46_v22 = vld [vmem:[#allocation5 + $0x18] sm:$0xff]  ;;  %v45_v24 = vld [vmem:[#allocation5 + $0x10] sm:$0xff]  ;;  %v64_v25 = vld [vmem:[#allocation5 + $0xa8] sm:$0xff] }
  0x14   :  { %99 = vmatpush.msra.mxu0 %v54_v5  ;;  %120 = vmatpush.msra.mxu1 %v72_v9  ;;  %v44_v26 = vld [vmem:[#allocation5 + $0x8] sm:$0xff]  ;;  %v63_v27 = vld [vmem:[#allocation5 + $0xa0] sm:$0xff]  ;;  %v42_v29 = vld [vmem:[#allocation2] sm:$0xff] }
  0x15   :  { %v43_v28 = vld [vmem:[#allocation5] sm:$0xff]  ;;  %v62_v30 = vld [vmem:[#allocation5 + $0x98] sm:$0xff]  ;;  %v61_v31 = vld [vmem:[#allocation5 + $0x90] sm:$0xff] }
  0x16   :  { %100 = vmatpush.msra.mxu0 %v53_v8  ;;  %121 = vmatpush.msra.mxu1 %v71_v11  ;;  %v60_v32 = vld [vmem:[#allocation5 + $0x88] sm:$0xff]  ;;  %v91_v34 = vld [vmem:[#allocation5 + $0x180] sm:$0xff]  ;;  %v90_v35 = vld [vmem:[#allocation5 + $0x178] sm:$0xff] }
  0x17   :  { %v92_v33 = vld [vmem:[#allocation5 + $0x188] sm:$0xff]  ;;  %v89_v36 = vld [vmem:[#allocation5 + $0x170] sm:$0xff]  ;;  %v87_v38 = vld [vmem:[#allocation5 + $0x160] sm:$0xff] }
  0x18   :  { %101 = vmatpush.msra.mxu0 %v52_v10  ;;  %122 = vmatpush.msra.mxu1 %v70_v13  ;;  %v88_v37 = vld [vmem:[#allocation5 + $0x168] sm:$0xff]  ;;  %v86_v39 = vld [vmem:[#allocation5 + $0x158] sm:$0xff]  ;;  %v85_v40 = vld [vmem:[#allocation5 + $0x150] sm:$0xff] }
  0x19   :  { %139 = vmatpush.msra.mxu2 %v92_v33  ;;  %v84_v41 = vld [vmem:[#allocation5 + $0x148] sm:$0xff]  ;;  %v83_v42 = vld [vmem:[#allocation5 + $0x140] sm:$0xff]  ;;  %v82_v43 = vld [vmem:[#allocation5 + $0x138] sm:$0xff] }
  0x1a   :  { %102 = vmatpush.msra.mxu0 %v51_v12  ;;  %123 = vmatpush.msra.mxu1 %v69_v15  ;;  %v81_v44 = vld [vmem:[#allocation5 + $0x130] sm:$0xff]  ;;  %v80_v45 = vld [vmem:[#allocation5 + $0x128] sm:$0xff]  ;;  %v184_v46 = vld [vmem:[#allocation5 + $0x80] ss:$0 sm:$0xff] }
  0x1b   :  { %140 = vmatpush.msra.mxu2 %v91_v34  ;;  %v79_v50 = vld [vmem:[#allocation5 + $0x120] sm:$0xff]  ;;  %v78_v51 = vld [vmem:[#allocation5 + $0x118] sm:$0xff]  ;;  %v77_v52 = vld [vmem:[#allocation5 + $0x110] sm:$0xff] }
  0x1c   :  { %103 = vmatpush.msra.mxu0 %v50_v14  ;;  %124 = vmatpush.msra.mxu1 %v68_v17  ;;  %v185_v53 = vld [vmem:[#allocation5 + $0x108] ss:$0 sm:$0xff]  ;;  %v186_v57 = vld [vmem:[#allocation5 + $0x190] ss:$0 sm:$0xff] }
  0x1d   :  { %141 = vmatpush.msra.mxu2 %v90_v35 }
  0x1e   :  { %104 = vmatpush.msra.mxu0 %v49_v16  ;;  %125 = vmatpush.msra.mxu1 %v67_v19 }
  0x1f   :  { %142 = vmatpush.msra.mxu2 %v89_v36 }
  0x20   :  { %105 = vmatpush.msra.mxu0 %v48_v18  ;;  %126 = vmatpush.msra.mxu1 %v66_v21 }
  0x21   :  { %143 = vmatpush.msra.mxu2 %v88_v37 }
  0x22   :  { %106 = vmatpush.msra.mxu0 %v47_v20  ;;  %127 = vmatpush.msra.mxu1 %v65_v23 }
  0x23   :  { %144 = vmatpush.msra.mxu2 %v87_v38 }
  0x24   :  { %107 = vmatpush.msra.mxu0 %v46_v22  ;;  %128 = vmatpush.msra.mxu1 %v64_v25 }
  0x25   :  { %145 = vmatpush.msra.mxu2 %v86_v39 }
  0x26   :  { %108 = vmatpush.msra.mxu0 %v45_v24  ;;  %129 = vmatpush.msra.mxu1 %v63_v27 }
  0x27   :  { %146 = vmatpush.msra.mxu2 %v85_v40 }
  0x28   :  { %109 = vmatpush.msra.mxu0 %v44_v26  ;;  %130 = vmatpush.msra.mxu1 %v62_v30 }
  0x29   :  { %147 = vmatpush.msra.mxu2 %v84_v41 }
  0x2a   :  { %110 = vmatpush.msra.mxu0 %v43_v28  ;;  %131 = vmatpush.msra.mxu1 %v61_v31 }
  0x2b   :  { %111 = vmatmul.f32.vlgmr.msra.gmra.mxu0 %v42_v29  ;;  %148 = vmatpush.msra.mxu2 %v83_v42 }
  0x2c   :  { %132 = vmatpush.msra.mxu1 %v60_v32 }
  0x2d   :  { %149 = vmatpush.msra.mxu2 %v82_v43 }
  0x2f   :  { %150 = vmatpush.msra.mxu2 %v81_v44 }
  0x31   :  { %151 = vmatpush.msra.mxu2 %v80_v45 }
  0x33   :  { %152 = vmatpush.msra.mxu2 %v79_v50 }
  0x35   :  { %153 = vmatpush.msra.mxu2 %v78_v51 }
  0x37   :  { %154 = vmatpush.msra.mxu2 %v77_v52 }
  0xa8   :  { %v112_v47 = vpop.f32.mrf.mxu0 }
  0xa9   :  { %v113_v48 = vadd.f32 %v184_v46, %v112_v47 }
  0xab   :  { %v115_v49 = vmax.f32 %v113_v48, 0.0 }
  0xad   :  { %133 = vmatmul.f32.vlgmr.msra.gmra.mxu1 %v115_v49 }
 0x12a   :  { %v134_v54 = vpop.f32.mrf.mxu1 }
 0x12b   :  { %v135_v55 = vadd.f32 %v185_v53, %v134_v54 }
 0x12d   :  { %v137_v56 = vmax.f32 %v135_v55, 0.0 }
 0x12f   :  { %155 = vmatmul.f32.vlgmr.msra.gmra.mxu2 %v137_v56 }
 0x1b2   :  { %v156_v58 = vpop.f32.mrf.mxu2 }
 0x1b3   :  { %v157_v59 = vadd.f32 %v186_v57, %v156_v58 }
 0x1b5   :  { %187 = vtanh.f32 %v157_v59 }
 0x1bb   :  { %v188_v60 = vpop.eup %187 }
 0x1bc   :  { %160 = vst [vmem:[#allocation7] sm:$0xff] %v188_v60 }
 0x1bd   :  { %171 = dma.vmem_to_hbm [thread:$0]  %s167_s1, 128, %s169_s23, [#allocation4]  }
 0x1be   :  { %265 = dma.done.wait [#allocation4], 128  }
 0x1bf   :  { %266 = vsyncadd [#allocation4], 4294967168 }
 0x1c0   :  { %176 = vsyncpa [#allocation3], 1 }
 0x1c1   :  { %177 = vsyncpa [#allocation6], 1 }
 0x1c2   :  { %178 = vsyncpa [#allocation4], 1 }

</bundles_post_ra>
